<compile_context>
chip_gen: v5e
topology: v5e:2x2
jax: 0.10.0
libtpu: 0.0.40
codegen_flags: <defaults>
</compile_context>

<pallas_src>
import functools

import jax
import jax.numpy as jnp
from jax import lax
from jax.experimental import pallas as pl
from jax.experimental.pallas import tpu as pltpu


# --------------------------------------------------------------------------- #
# Kernel
# --------------------------------------------------------------------------- #
def _self_output_kernel(x_ref, res_ref,
                        wd_ref, bd_ref,        # dense:        (H, H), (1, H)   [in, out]
                        g_ref, be_ref,         # layernorm:    (1, H), (1, H)
                        wdn_ref, bdn_ref,      # adapter down: (H, D), (1, D)
                        wup_ref, bup_ref,      # adapter up:   (D, H), (1, H)
                        o_ref, *, eps):
    # ---- dense: x @ Wd + b (MXU, operands in weight dtype, f32 accumulator) --
    x = x_ref[...].astype(wd_ref.dtype)
    h = jnp.dot(x, wd_ref[...], preferred_element_type=jnp.float32)
    h = h + bd_ref[...].astype(jnp.float32)

    # ---- LayerNorm over the hidden dim (f32, single pass, clamped variance) --
    mu = jnp.mean(h, axis=-1, keepdims=True)
    var = jnp.maximum(jnp.mean(h * h, axis=-1, keepdims=True) - mu * mu, 0.0)
    hn = (h - mu) * lax.rsqrt(var + eps)
    hn = hn * g_ref[...].astype(jnp.float32) + be_ref[...].astype(jnp.float32)

    # ---- adapter down + relu -------------------------------------------------
    d = jnp.dot(hn.astype(wdn_ref.dtype), wdn_ref[...],
                preferred_element_type=jnp.float32)
    d = jnp.maximum(d + bdn_ref[...].astype(jnp.float32), 0.0)

    # ---- adapter up ----------------------------------------------------------
    u = jnp.dot(d.astype(wup_ref.dtype), wup_ref[...],
                preferred_element_type=jnp.float32)
    u = u + bup_ref[...].astype(jnp.float32)

    # ---- residual with the original input_tensor -----------------------------
    o_ref[...] = (u + res_ref[...].astype(jnp.float32)).astype(o_ref.dtype)


# --------------------------------------------------------------------------- #
# One-time parameter preparation (do NOT redo this every forward call)
# --------------------------------------------------------------------------- #
def prepare_params(params, compute_dtype=jnp.bfloat16):
    """Transpose PyTorch-style (out, in) weights to (in, out) and cast once."""
    def w(a):
        return jnp.asarray(a).T.astype(compute_dtype)       # (out, in) -> (in, out)

    def v(a):
        return jnp.asarray(a, jnp.float32).reshape(1, -1)    # keep small vectors f32

    return {
        "wd": w(params["w_dense"]),  "bd": v(params["b_dense"]),
        "g":  v(params["ln_gamma"]), "be": v(params["ln_beta"]),
        "wdn": w(params["w_down"]),  "bdn": v(params["b_down"]),
        "wup": w(params["w_up"]),    "bup": v(params["b_up"]),
    }


# --------------------------------------------------------------------------- #
# Forward wrapper
# --------------------------------------------------------------------------- #
def meta_adapter_bert_self_output(hidden_states, input_tensor, prepared,
                                  *, eps=1e-12, row_tile=512):
    """hidden_states, input_tensor: (B, S, H). Returns (B, S, H)."""
    B, S, H = hidden_states.shape
    M = B * S
    D = prepared["wdn"].shape[1]

    x = hidden_states.reshape(M, H)      # contiguous reshape, no data movement
    res = input_tensor.reshape(M, H)

    # ---- per-generation VMEM budget (3/4 of physical leaves compiler headroom)
    try:
        vmem_physical = int(pltpu.get_tpu_info().vmem_capacity_bytes)
    except Exception:
        vmem_physical = 64 << 20          # conservative (v7x) if query unavailable
    vmem_cap = (vmem_physical * 3) // 4   # ~48 MiB v7x, ~96 MiB v5e/v6e

    w_bytes = sum(int(prepared[k].size) * prepared[k].dtype.itemsize
                  for k in ("wd", "wdn", "wup"))
    small_bytes = sum(int(prepared[k].size) * prepared[k].dtype.itemsize
                      for k in ("bd", "g", "be", "bdn", "bup"))
    act_itemsize = jnp.dtype(hidden_states.dtype).itemsize

    # ---- row tiling: big tiles, multiples of 8; ragged last tile via cdiv grid
    if M <= row_tile:
        row_tile = M                       # single block == full row extent (allowed)
    else:
        row_tile = max(8, (row_tile // 8) * 8)

    def vmem_estimate(rt, const_bufs):
        io_bytes = 2 * 3 * rt * H * act_itemsize           # x/res/out, double-buffered
        f32_tmp = 3 * rt * H * 4 + rt * D * 4               # h/hn/u + d intermediates
        return const_bufs * (w_bytes + small_bytes) + io_bytes + f32_tmp + (2 << 20)

    # Shrink the row tile (never evict the weights) until the estimate fits.
    while row_tile > 64 and vmem_estimate(row_tile, 2) > vmem_cap:
        row_tile = max(64, ((row_tile // 2) // 8) * 8)

    vmem_limit = int(min(vmem_cap, max(vmem_estimate(row_tile, 2), 32 << 20)))
    grid = (pl.cdiv(M, row_tile),)

    cost = pl.CostEstimate(
        flops=2 * M * (H * H + 2 * H * D),
        transcendentals=M,
        bytes_accessed=3 * M * H * act_itemsize + w_bytes + small_bytes,
    )

    buffered_cls = getattr(pl, "Buffered", None)

    def run(single_buffer_consts):
        def const_spec(shape):
            # Constant operands: index_map never changes -> DMA'd once.
            # Buffered(1) avoids allocating a useless second VMEM buffer.
            if single_buffer_consts and buffered_cls is not None:
                return pl.BlockSpec(shape, lambda i: (0, 0),
                                    pipeline_mode=buffered_cls(1))
            return pl.BlockSpec(shape, lambda i: (0, 0))

        row_spec = pl.BlockSpec((row_tile, H), lambda i: (i, 0))

        return pl.pallas_call(
            functools.partial(_self_output_kernel, eps=eps),
            out_shape=jax.ShapeDtypeStruct((M, H), hidden_states.dtype),
            grid=grid,
            in_specs=[
                row_spec,                            # x
                row_spec,                            # residual
                const_spec(prepared["wd"].shape),    # W_dense   (in, out)
                const_spec(prepared["bd"].shape),    # b_dense
                const_spec(prepared["g"].shape),     # ln gamma
                const_spec(prepared["be"].shape),    # ln beta
                const_spec(prepared["wdn"].shape),   # W_down    (in, out)
                const_spec(prepared["bdn"].shape),   # b_down
                const_spec(prepared["wup"].shape),   # W_up      (in, out)
                const_spec(prepared["bup"].shape),   # b_up
            ],
            out_specs=pl.BlockSpec((row_tile, H), lambda i: (i, 0)),
            compiler_params=pltpu.CompilerParams(
                dimension_semantics=("parallel",),
                vmem_limit_bytes=vmem_limit),
            cost_estimate=cost,
        )(x, res, prepared["wd"], prepared["bd"], prepared["g"], prepared["be"],
          prepared["wdn"], prepared["bdn"], prepared["wup"], prepared["bup"])

    try:
        out = run(single_buffer_consts=True)
    except Exception:
        # Fallback for JAX versions that reject pipeline_mode=Buffered(1).
        out = run(single_buffer_consts=False)

    return out.reshape(B, S, H)


# --------------------------------------------------------------------------- #
# Init + reference + test
# --------------------------------------------------------------------------- #
def _xavier_uniform(key, out_f, in_f, dtype=jnp.float32):
    bound = jnp.sqrt(6.0 / (in_f + out_f))
    return jax.random.uniform(key, (out_f, in_f), dtype, -bound, bound)


def init_params(key, hidden_size, down_sample):
    k1, k2, k3 = jax.random.split(key, 3)
    H, D = hidden_size, down_sample
    return {
        # MetaLinearLayer(dense): xavier_uniform weight, zero bias
        "w_dense": _xavier_uniform(k1, H, H),
        "b_dense": jnp.zeros((1, H), jnp.float32),
        # MetaLayerNormLayer: weight=1, bias=0
        "ln_gamma": jnp.ones((1, H), jnp.float32),
        "ln_beta": jnp.zeros((1, H), jnp.float32),
        # adapter down / up
        "w_down": _xavier_uniform(k2, D, H),
        "b_down": jnp.zeros((1, D), jnp.float32),
        "w_up": _xavier_uniform(k3, H, D),
        "b_up": jnp.zeros((1, H), jnp.float32),
    }


def _reference(hidden_states, input_tensor, params, eps=1e-12):
    h = hidden_states @ params["w_dense"].T + params["b_dense"][0]
    mu = jnp.mean(h, axis=-1, keepdims=True)
    var = jnp.mean((h - mu) ** 2, axis=-1, keepdims=True)
    h = (h - mu) / jnp.sqrt(var + eps) * params["ln_gamma"][0] + params["ln_beta"][0]
    d = jnp.maximum(h @ params["w_down"].T + params["b_down"][0], 0.0)
    u = d @ params["w_up"].T + params["b_up"][0]
    return u + input_tensor


if __name__ == "__main__":
    # config: hidden_size=32, adapter_down_sample_size=16, relu non-linearity
    B, S, H, D = 2, 8, 32, 16

    key = jax.random.PRNGKey(0)
    k_hs, k_in, k_p = jax.random.split(key, 3)
    hidden_states = jax.random.normal(k_hs, (B, S, H), jnp.float32)
    input_tensor = jax.random.normal(k_in, (B, S, H), jnp.float32)
    params = init_params(k_p, H, D)

    # One-time weight prep (transpose + bf16 cast), reused across forward calls.
    prepared = prepare_params(params, compute_dtype=jnp.bfloat16)

    out = meta_adapter_bert_self_output(hidden_states, input_tensor, prepared)
    out = jax.block_until_ready(out)

    ref = _reference(hidden_states, input_tensor, params)
    assert out.shape == (B, S, H)
    # bf16 matmul operands (f32 accumulation) vs. an all-f32 reference.
    assert jnp.allclose(out, ref, atol=5e-2, rtol=5e-2), "mismatch vs reference"

    print("KERNEL_OK")
</pallas_src>

<mosaic_0001>
module attributes {stable_mosaic.version = 11 : i64} {
  func.func @_self_output_kernel(%arg0: i32, %arg1: memref<16x32xf32, #tpu.memory_space<vmem>>, %arg2: memref<16x32xf32, #tpu.memory_space<vmem>>, %arg3: memref<32x32xbf16, #tpu.memory_space<vmem>>, %arg4: memref<1x32xf32, #tpu.memory_space<vmem>>, %arg5: memref<1x32xf32, #tpu.memory_space<vmem>>, %arg6: memref<1x32xf32, #tpu.memory_space<vmem>>, %arg7: memref<32x16xbf16, #tpu.memory_space<vmem>>, %arg8: memref<1x16xf32, #tpu.memory_space<vmem>>, %arg9: memref<16x32xbf16, #tpu.memory_space<vmem>>, %arg10: memref<1x32xf32, #tpu.memory_space<vmem>>, %arg11: memref<16x32xf32, #tpu.memory_space<vmem>>) attributes {dimension_semantics = [#tpu.dimension_semantics<parallel>], iteration_bounds = array<i64: 1>, scalar_prefetch = 0 : i64, scratch_operands = 0 : i64, tpu.core_type = #tpu.core_type<tc>, window_params = [{transform_indices = @transform_0, window_bounds = array<i64: 16, 32>}, {transform_indices = @transform_1, window_bounds = array<i64: 16, 32>}, {pipeline_mode = #tpu.pipeline_mode<synchronous>, transform_indices = @transform_2, window_bounds = array<i64: 32, 32>}, {pipeline_mode = #tpu.pipeline_mode<synchronous>, transform_indices = @transform_3, window_bounds = array<i64: 1, 32>}, {pipeline_mode = #tpu.pipeline_mode<synchronous>, transform_indices = @transform_4, window_bounds = array<i64: 1, 32>}, {pipeline_mode = #tpu.pipeline_mode<synchronous>, transform_indices = @transform_5, window_bounds = array<i64: 1, 32>}, {pipeline_mode = #tpu.pipeline_mode<synchronous>, transform_indices = @transform_6, window_bounds = array<i64: 32, 16>}, {pipeline_mode = #tpu.pipeline_mode<synchronous>, transform_indices = @transform_7, window_bounds = array<i64: 1, 16>}, {pipeline_mode = #tpu.pipeline_mode<synchronous>, transform_indices = @transform_8, window_bounds = array<i64: 16, 32>}, {pipeline_mode = #tpu.pipeline_mode<synchronous>, transform_indices = @transform_9, window_bounds = array<i64: 1, 32>}, {transform_indices = @transform_10, window_bounds = array<i64: 16, 32>}]} {
    %c0 = arith.constant 0 : index
    %c0_0 = arith.constant 0 : index
    %0 = vector.load %arg1[%c0, %c0_0] : memref<16x32xf32, #tpu.memory_space<vmem>>, vector<16x32xf32>
    %1 = arith.truncf %0 : vector<16x32xf32> to vector<16x32xbf16>
    %c0_1 = arith.constant 0 : index
    %c0_2 = arith.constant 0 : index
    %2 = vector.load %arg3[%c0_1, %c0_2] : memref<32x32xbf16, #tpu.memory_space<vmem>>, vector<32x32xbf16>
    %cst = arith.constant dense<0.000000e+00> : vector<16x32xf32>
    %3 = tpu.matmul %1, %2, %cst {dimension_numbers = #tpu.dot_dimension_numbers<[1], [0], [0], [1], [0, 0, 1, 1], [], []>} : vector<16x32xbf16>, vector<32x32xbf16>, vector<16x32xf32> -> vector<16x32xf32>
    %c0_3 = arith.constant 0 : index
    %c0_4 = arith.constant 0 : index
    %4 = vector.load %arg4[%c0_3, %c0_4] : memref<1x32xf32, #tpu.memory_space<vmem>>, vector<1x32xf32>
    %5 = vector.broadcast %4 : vector<1x32xf32> to vector<16x32xf32>
    %6 = arith.addf %3, %5 : vector<16x32xf32>
    %cst_5 = arith.constant dense<0.000000e+00> : vector<16xf32>
    %7 = vector.multi_reduction <add>, %6, %cst_5 [1] : vector<16x32xf32> to vector<16xf32>
    %8 = vector.shape_cast %7 : vector<16xf32> to vector<16x1xf32>
    %cst_6 = arith.constant 3.200000e+01 : f32
    %9 = vector.broadcast %cst_6 : f32 to vector<16x1xf32>
    %10 = arith.divf %8, %9 : vector<16x1xf32>
    %11 = arith.mulf %6, %6 : vector<16x32xf32>
    %cst_7 = arith.constant dense<0.000000e+00> : vector<16xf32>
    %12 = vector.multi_reduction <add>, %11, %cst_7 [1] : vector<16x32xf32> to vector<16xf32>
    %13 = vector.shape_cast %12 : vector<16xf32> to vector<16x1xf32>
    %cst_8 = arith.constant 3.200000e+01 : f32
    %14 = vector.broadcast %cst_8 : f32 to vector<16x1xf32>
    %15 = arith.divf %13, %14 : vector<16x1xf32>
    %16 = arith.mulf %10, %10 : vector<16x1xf32>
    %17 = arith.subf %15, %16 : vector<16x1xf32>
    %cst_9 = arith.constant 0.000000e+00 : f32
    %18 = vector.broadcast %cst_9 : f32 to vector<16x1xf32>
    %19 = arith.maximumf %17, %18 : vector<16x1xf32>
    %20 = vector.broadcast %10 : vector<16x1xf32> to vector<16x32xf32>
    %21 = arith.subf %6, %20 : vector<16x32xf32>
    %cst_10 = arith.constant 9.99999996E-13 : f32
    %22 = vector.broadcast %cst_10 : f32 to vector<16x1xf32>
    %23 = arith.addf %19, %22 : vector<16x1xf32>
    %24 = math.rsqrt %23 : vector<16x1xf32>
    %25 = vector.broadcast %24 : vector<16x1xf32> to vector<16x32xf32>
    %26 = arith.mulf %21, %25 : vector<16x32xf32>
    %c0_11 = arith.constant 0 : index
    %c0_12 = arith.constant 0 : index
    %27 = vector.load %arg5[%c0_11, %c0_12] : memref<1x32xf32, #tpu.memory_space<vmem>>, vector<1x32xf32>
    %28 = vector.broadcast %27 : vector<1x32xf32> to vector<16x32xf32>
    %29 = arith.mulf %26, %28 : vector<16x32xf32>
    %c0_13 = arith.constant 0 : index
    %c0_14 = arith.constant 0 : index
    %30 = vector.load %arg6[%c0_13, %c0_14] : memref<1x32xf32, #tpu.memory_space<vmem>>, vector<1x32xf32>
    %31 = vector.broadcast %30 : vector<1x32xf32> to vector<16x32xf32>
    %32 = arith.addf %29, %31 : vector<16x32xf32>
    %33 = arith.truncf %32 : vector<16x32xf32> to vector<16x32xbf16>
    %c0_15 = arith.constant 0 : index
    %c0_16 = arith.constant 0 : index
    %34 = vector.load %arg7[%c0_15, %c0_16] : memref<32x16xbf16, #tpu.memory_space<vmem>>, vector<32x16xbf16>
    %cst_17 = arith.constant dense<0.000000e+00> : vector<16x16xf32>
    %35 = tpu.matmul %33, %34, %cst_17 {dimension_numbers = #tpu.dot_dimension_numbers<[1], [0], [0], [1], [0, 0, 1, 1], [], []>} : vector<16x32xbf16>, vector<32x16xbf16>, vector<16x16xf32> -> vector<16x16xf32>
    %c0_18 = arith.constant 0 : index
    %c0_19 = arith.constant 0 : index
    %36 = vector.load %arg8[%c0_18, %c0_19] : memref<1x16xf32, #tpu.memory_space<vmem>>, vector<1x16xf32>
    %37 = vector.broadcast %36 : vector<1x16xf32> to vector<16x16xf32>
    %38 = arith.addf %35, %37 : vector<16x16xf32>
    %cst_20 = arith.constant 0.000000e+00 : f32
    %39 = vector.broadcast %cst_20 : f32 to vector<16x16xf32>
    %40 = arith.maximumf %38, %39 : vector<16x16xf32>
    %41 = arith.truncf %40 : vector<16x16xf32> to vector<16x16xbf16>
    %c0_21 = arith.constant 0 : index
    %c0_22 = arith.constant 0 : index
    %42 = vector.load %arg9[%c0_21, %c0_22] : memref<16x32xbf16, #tpu.memory_space<vmem>>, vector<16x32xbf16>
    %cst_23 = arith.constant dense<0.000000e+00> : vector<16x32xf32>
    %43 = tpu.matmul %41, %42, %cst_23 {dimension_numbers = #tpu.dot_dimension_numbers<[1], [0], [0], [1], [0, 0, 1, 1], [], []>} : vector<16x16xbf16>, vector<16x32xbf16>, vector<16x32xf32> -> vector<16x32xf32>
    %c0_24 = arith.constant 0 : index
    %c0_25 = arith.constant 0 : index
    %44 = vector.load %arg10[%c0_24, %c0_25] : memref<1x32xf32, #tpu.memory_space<vmem>>, vector<1x32xf32>
    %45 = vector.broadcast %44 : vector<1x32xf32> to vector<16x32xf32>
    %46 = arith.addf %43, %45 : vector<16x32xf32>
    %c0_26 = arith.constant 0 : index
    %c0_27 = arith.constant 0 : index
    %47 = vector.load %arg2[%c0_26, %c0_27] : memref<16x32xf32, #tpu.memory_space<vmem>>, vector<16x32xf32>
    %48 = arith.addf %46, %47 : vector<16x32xf32>
    %c0_28 = arith.constant 0 : index
    %c0_29 = arith.constant 0 : index
    %49 = vector.load %arg11[%c0_28, %c0_29] : memref<16x32xf32, #tpu.memory_space<vmem>>, vector<16x32xf32>
    tpu.vector_store %arg11[%c0_28, %c0_29], %48 {strides = array<i32>} : memref<16x32xf32, #tpu.memory_space<vmem>>, vector<16x32xf32>,
    return
  }
  func.func @transform_0(%arg0: i32) -> (i32, i32) {
    %c0_i32 = arith.constant 0 : i32
    %c0_i32_0 = arith.constant 0 : i32
    return %arg0, %c0_i32 : i32, i32
  }
  func.func @transform_1(%arg0: i32) -> (i32, i32) {
    %c0_i32 = arith.constant 0 : i32
    %c0_i32_0 = arith.constant 0 : i32
    return %arg0, %c0_i32 : i32, i32
  }
  func.func @transform_2(%arg0: i32) -> (i32, i32) {
    %c0_i32 = arith.constant 0 : i32
    %c0_i32_0 = arith.constant 0 : i32
    %c0_i32_1 = arith.constant 0 : i32
    return %c0_i32, %c0_i32_0 : i32, i32
  }
  func.func @transform_3(%arg0: i32) -> (i32, i32) {
    %c0_i32 = arith.constant 0 : i32
    %c0_i32_0 = arith.constant 0 : i32
    %c0_i32_1 = arith.constant 0 : i32
    return %c0_i32, %c0_i32_0 : i32, i32
  }
  func.func @transform_4(%arg0: i32) -> (i32, i32) {
    %c0_i32 = arith.constant 0 : i32
    %c0_i32_0 = arith.constant 0 : i32
    %c0_i32_1 = arith.constant 0 : i32
    return %c0_i32, %c0_i32_0 : i32, i32
  }
  func.func @transform_5(%arg0: i32) -> (i32, i32) {
    %c0_i32 = arith.constant 0 : i32
    %c0_i32_0 = arith.constant 0 : i32
    %c0_i32_1 = arith.constant 0 : i32
    return %c0_i32, %c0_i32_0 : i32, i32
  }
  func.func @transform_6(%arg0: i32) -> (i32, i32) {
    %c0_i32 = arith.constant 0 : i32
    %c0_i32_0 = arith.constant 0 : i32
    %c0_i32_1 = arith.constant 0 : i32
    return %c0_i32, %c0_i32_0 : i32, i32
  }
  func.func @transform_7(%arg0: i32) -> (i32, i32) {
    %c0_i32 = arith.constant 0 : i32
    %c0_i32_0 = arith.constant 0 : i32
    %c0_i32_1 = arith.constant 0 : i32
    return %c0_i32, %c0_i32_0 : i32, i32
  }
  func.func @transform_8(%arg0: i32) -> (i32, i32) {
    %c0_i32 = arith.constant 0 : i32
    %c0_i32_0 = arith.constant 0 : i32
    %c0_i32_1 = arith.constant 0 : i32
    return %c0_i32, %c0_i32_0 : i32, i32
  }
  func.func @transform_9(%arg0: i32) -> (i32, i32) {
    %c0_i32 = arith.constant 0 : i32
    %c0_i32_0 = arith.constant 0 : i32
    %c0_i32_1 = arith.constant 0 : i32
    return %c0_i32, %c0_i32_0 : i32, i32
  }
  func.func @transform_10(%arg0: i32) -> (i32, i32) {
    %c0_i32 = arith.constant 0 : i32
    %c0_i32_0 = arith.constant 0 : i32
    return %arg0, %c0_i32 : i32, i32
  }
}

module attributes {stable_mosaic.version = 11 : i64} {
  func.func @_self_output_kernel(%arg0: i32, %arg1: memref<16x32xf32, #tpu.memory_space<vmem>>, %arg2: memref<16x32xf32, #tpu.memory_space<vmem>>, %arg3: memref<32x32xbf16, #tpu.memory_space<vmem>>, %arg4: memref<1x32xf32, #tpu.memory_space<vmem>>, %arg5: memref<1x32xf32, #tpu.memory_space<vmem>>, %arg6: memref<1x32xf32, #tpu.memory_space<vmem>>, %arg7: memref<32x16xbf16, #tpu.memory_space<vmem>>, %arg8: memref<1x16xf32, #tpu.memory_space<vmem>>, %arg9: memref<16x32xbf16, #tpu.memory_space<vmem>>, %arg10: memref<1x32xf32, #tpu.memory_space<vmem>>, %arg11: memref<16x32xf32, #tpu.memory_space<vmem>>) attributes {dimension_semantics = [#tpu.dimension_semantics<parallel>], iteration_bounds = array<i64: 1>, scalar_prefetch = 0 : i64, scratch_operands = 0 : i64, tpu.core_type = #tpu.core_type<tc>, window_params = [{transform_indices = @transform_0, window_bounds = array<i64: 16, 32>}, {transform_indices = @transform_1, window_bounds = array<i64: 16, 32>}, {pipeline_mode = #tpu.pipeline_mode<synchronous>, transform_indices = @transform_2, window_bounds = array<i64: 32, 32>}, {pipeline_mode = #tpu.pipeline_mode<synchronous>, transform_indices = @transform_3, window_bounds = array<i64: 1, 32>}, {pipeline_mode = #tpu.pipeline_mode<synchronous>, transform_indices = @transform_4, window_bounds = array<i64: 1, 32>}, {pipeline_mode = #tpu.pipeline_mode<synchronous>, transform_indices = @transform_5, window_bounds = array<i64: 1, 32>}, {pipeline_mode = #tpu.pipeline_mode<synchronous>, transform_indices = @transform_6, window_bounds = array<i64: 32, 16>}, {pipeline_mode = #tpu.pipeline_mode<synchronous>, transform_indices = @transform_7, window_bounds = array<i64: 1, 16>}, {pipeline_mode = #tpu.pipeline_mode<synchronous>, transform_indices = @transform_8, window_bounds = array<i64: 16, 32>}, {pipeline_mode = #tpu.pipeline_mode<synchronous>, transform_indices = @transform_9, window_bounds = array<i64: 1, 32>}, {transform_indices = @transform_10, window_bounds = array<i64: 16, 32>}]} {
    %c0 = arith.constant 0 : index
    %c0_0 = arith.constant 0 : index
    %0 = vector.load %arg1[%c0, %c0_0] : memref<16x32xf32, #tpu.memory_space<vmem>>, vector<16x32xf32>
    %1 = arith.truncf %0 : vector<16x32xf32> to vector<16x32xbf16>
    %c0_1 = arith.constant 0 : index
    %c0_2 = arith.constant 0 : index
    %2 = vector.load %arg3[%c0_1, %c0_2] : memref<32x32xbf16, #tpu.memory_space<vmem>>, vector<32x32xbf16>
    %cst = arith.constant dense<0.000000e+00> : vector<16x32xf32>
    %3 = tpu.matmul %1, %2, %cst {dimension_numbers = #tpu.dot_dimension_numbers<[1], [0], [0], [1], [0, 0, 1, 1], [], []>} : vector<16x32xbf16>, vector<32x32xbf16>, vector<16x32xf32> -> vector<16x32xf32>
    %c0_3 = arith.constant 0 : index
    %c0_4 = arith.constant 0 : index
    %4 = vector.load %arg4[%c0_3, %c0_4] : memref<1x32xf32, #tpu.memory_space<vmem>>, vector<1x32xf32>
    %5 = vector.broadcast %4 : vector<1x32xf32> to vector<16x32xf32>
    %6 = arith.addf %3, %5 : vector<16x32xf32>
    %cst_5 = arith.constant dense<0.000000e+00> : vector<16xf32>
    %7 = vector.multi_reduction <add>, %6, %cst_5 [1] : vector<16x32xf32> to vector<16xf32>
    %8 = vector.shape_cast %7 : vector<16xf32> to vector<16x1xf32>
    %cst_6 = arith.constant 3.200000e+01 : f32
    %9 = vector.broadcast %cst_6 : f32 to vector<16x1xf32>
    %10 = arith.divf %8, %9 : vector<16x1xf32>
    %11 = arith.mulf %6, %6 : vector<16x32xf32>
    %cst_7 = arith.constant dense<0.000000e+00> : vector<16xf32>
    %12 = vector.multi_reduction <add>, %11, %cst_7 [1] : vector<16x32xf32> to vector<16xf32>
    %13 = vector.shape_cast %12 : vector<16xf32> to vector<16x1xf32>
    %cst_8 = arith.constant 3.200000e+01 : f32
    %14 = vector.broadcast %cst_8 : f32 to vector<16x1xf32>
    %15 = arith.divf %13, %14 : vector<16x1xf32>
    %16 = arith.mulf %10, %10 : vector<16x1xf32>
    %17 = arith.subf %15, %16 : vector<16x1xf32>
    %cst_9 = arith.constant 0.000000e+00 : f32
    %18 = vector.broadcast %cst_9 : f32 to vector<16x1xf32>
    %19 = arith.maximumf %17, %18 : vector<16x1xf32>
    %20 = vector.broadcast %10 : vector<16x1xf32> to vector<16x32xf32>
    %21 = arith.subf %6, %20 : vector<16x32xf32>
    %cst_10 = arith.constant 9.99999996E-13 : f32
    %22 = vector.broadcast %cst_10 : f32 to vector<16x1xf32>
    %23 = arith.addf %19, %22 : vector<16x1xf32>
    %24 = math.rsqrt %23 : vector<16x1xf32>
    %25 = vector.broadcast %24 : vector<16x1xf32> to vector<16x32xf32>
    %26 = arith.mulf %21, %25 : vector<16x32xf32>
    %c0_11 = arith.constant 0 : index
    %c0_12 = arith.constant 0 : index
    %27 = vector.load %arg5[%c0_11, %c0_12] : memref<1x32xf32, #tpu.memory_space<vmem>>, vector<1x32xf32>
    %28 = vector.broadcast %27 : vector<1x32xf32> to vector<16x32xf32>
    %29 = arith.mulf %26, %28 : vector<16x32xf32>
    %c0_13 = arith.constant 0 : index
    %c0_14 = arith.constant 0 : index
    %30 = vector.load %arg6[%c0_13, %c0_14] : memref<1x32xf32, #tpu.memory_space<vmem>>, vector<1x32xf32>
    %31 = vector.broadcast %30 : vector<1x32xf32> to vector<16x32xf32>
    %32 = arith.addf %29, %31 : vector<16x32xf32>
    %33 = arith.truncf %32 : vector<16x32xf32> to vector<16x32xbf16>
    %c0_15 = arith.constant 0 : index
    %c0_16 = arith.constant 0 : index
    %34 = vector.load %arg7[%c0_15, %c0_16] : memref<32x16xbf16, #tpu.memory_space<vmem>>, vector<32x16xbf16>
    %cst_17 = arith.constant dense<0.000000e+00> : vector<16x16xf32>
    %35 = tpu.matmul %33, %34, %cst_17 {dimension_numbers = #tpu.dot_dimension_numbers<[1], [0], [0], [1], [0, 0, 1, 1], [], []>} : vector<16x32xbf16>, vector<32x16xbf16>, vector<16x16xf32> -> vector<16x16xf32>
    %c0_18 = arith.constant 0 : index
    %c0_19 = arith.constant 0 : index
    %36 = vector.load %arg8[%c0_18, %c0_19] : memref<1x16xf32, #tpu.memory_space<vmem>>, vector<1x16xf32>
    %37 = vector.broadcast %36 : vector<1x16xf32> to vector<16x16xf32>
    %38 = arith.addf %35, %37 : vector<16x16xf32>
    %cst_20 = arith.constant 0.000000e+00 : f32
    %39 = vector.broadcast %cst_20 : f32 to vector<16x16xf32>
    %40 = arith.maximumf %38, %39 : vector<16x16xf32>
    %41 = arith.truncf %40 : vector<16x16xf32> to vector<16x16xbf16>
    %c0_21 = arith.constant 0 : index
    %c0_22 = arith.constant 0 : index
    %42 = vector.load %arg9[%c0_21, %c0_22] : memref<16x32xbf16, #tpu.memory_space<vmem>>, vector<16x32xbf16>
    %cst_23 = arith.constant dense<0.000000e+00> : vector<16x32xf32>
    %43 = tpu.matmul %41, %42, %cst_23 {dimension_numbers = #tpu.dot_dimension_numbers<[1], [0], [0], [1], [0, 0, 1, 1], [], []>} : vector<16x16xbf16>, vector<16x32xbf16>, vector<16x32xf32> -> vector<16x32xf32>
    %c0_24 = arith.constant 0 : index
    %c0_25 = arith.constant 0 : index
    %44 = vector.load %arg10[%c0_24, %c0_25] : memref<1x32xf32, #tpu.memory_space<vmem>>, vector<1x32xf32>
    %45 = vector.broadcast %44 : vector<1x32xf32> to vector<16x32xf32>
    %46 = arith.addf %43, %45 : vector<16x32xf32>
    %c0_26 = arith.constant 0 : index
    %c0_27 = arith.constant 0 : index
    %47 = vector.load %arg2[%c0_26, %c0_27] : memref<16x32xf32, #tpu.memory_space<vmem>>, vector<16x32xf32>
    %48 = arith.addf %46, %47 : vector<16x32xf32>
    %c0_28 = arith.constant 0 : index
    %c0_29 = arith.constant 0 : index
    %49 = vector.load %arg11[%c0_28, %c0_29] : memref<16x32xf32, #tpu.memory_space<vmem>>, vector<16x32xf32>
    tpu.vector_store %arg11[%c0_28, %c0_29], %48 {strides = array<i32>} : memref<16x32xf32, #tpu.memory_space<vmem>>, vector<16x32xf32>,
    return
  }
  func.func @transform_0(%arg0: i32) -> (i32, i32) {
    %c0_i32 = arith.constant 0 : i32
    %c0_i32_0 = arith.constant 0 : i32
    return %arg0, %c0_i32 : i32, i32
  }
  func.func @transform_1(%arg0: i32) -> (i32, i32) {
    %c0_i32 = arith.constant 0 : i32
    %c0_i32_0 = arith.constant 0 : i32
    return %arg0, %c0_i32 : i32, i32
  }
  func.func @transform_2(%arg0: i32) -> (i32, i32) {
    %c0_i32 = arith.constant 0 : i32
    %c0_i32_0 = arith.constant 0 : i32
    %c0_i32_1 = arith.constant 0 : i32
    return %c0_i32, %c0_i32_0 : i32, i32
  }
  func.func @transform_3(%arg0: i32) -> (i32, i32) {
    %c0_i32 = arith.constant 0 : i32
    %c0_i32_0 = arith.constant 0 : i32
    %c0_i32_1 = arith.constant 0 : i32
    return %c0_i32, %c0_i32_0 : i32, i32
  }
  func.func @transform_4(%arg0: i32) -> (i32, i32) {
    %c0_i32 = arith.constant 0 : i32
    %c0_i32_0 = arith.constant 0 : i32
    %c0_i32_1 = arith.constant 0 : i32
    return %c0_i32, %c0_i32_0 : i32, i32
  }
  func.func @transform_5(%arg0: i32) -> (i32, i32) {
    %c0_i32 = arith.constant 0 : i32
    %c0_i32_0 = arith.constant 0 : i32
    %c0_i32_1 = arith.constant 0 : i32
    return %c0_i32, %c0_i32_0 : i32, i32
  }
  func.func @transform_6(%arg0: i32) -> (i32, i32) {
    %c0_i32 = arith.constant 0 : i32
    %c0_i32_0 = arith.constant 0 : i32
    %c0_i32_1 = arith.constant 0 : i32
    return %c0_i32, %c0_i32_0 : i32, i32
  }
  func.func @transform_7(%arg0: i32) -> (i32, i32) {
    %c0_i32 = arith.constant 0 : i32
    %c0_i32_0 = arith.constant 0 : i32
    %c0_i32_1 = arith.constant 0 : i32
    return %c0_i32, %c0_i32_0 : i32, i32
  }
  func.func @transform_8(%arg0: i32) -> (i32, i32) {
    %c0_i32 = arith.constant 0 : i32
    %c0_i32_0 = arith.constant 0 : i32
    %c0_i32_1 = arith.constant 0 : i32
    return %c0_i32, %c0_i32_0 : i32, i32
  }
  func.func @transform_9(%arg0: i32) -> (i32, i32) {
    %c0_i32 = arith.constant 0 : i32
    %c0_i32_0 = arith.constant 0 : i32
    %c0_i32_1 = arith.constant 0 : i32
    return %c0_i32, %c0_i32_0 : i32, i32
  }
  func.func @transform_10(%arg0: i32) -> (i32, i32) {
    %c0_i32 = arith.constant 0 : i32
    %c0_i32_0 = arith.constant 0 : i32
    return %arg0, %c0_i32 : i32, i32
  }
}

</mosaic_0001>

<bundles_post_ra>
// kernel: tpu_custom_call.1
= control target key start
LH: loop header
LB: loop body
LE: loop exit
PB: predicated region body
PF: predicated region fallthrough
CT: control target
= control target key end

     0   :  { %15 = vsyncpa [#allocation3], 0  ;;  %s517_s0 = inlined_call_operand.vmem [shape: f32[16,32], index: 0, kind: input, shape index: {}]   ;;  %s518_s1 = inlined_call_operand.hbm [shape: f32[16,32], index: 1, kind: input, shape index: {}]   ;;  %s519_s2 = inlined_call_operand.hbm [shape: bf16[32,32], index: 2, kind: input, shape index: {}]   ;;  %s520_s3 = inlined_call_operand.vmem [shape: f32[1,32], index: 3, kind: input, shape index: {}]   ;;  %s521_s4 = inlined_call_operand.vmem [shape: f32[1,32], index: 4, kind: input, shape index: {}]   ;;  %s522_s5 = inlined_call_operand.vmem [shape: f32[1,32], index: 5, kind: input, shape index: {}]   ;;  %s523_s6 = inlined_call_operand.vmem [shape: bf16[32,16], index: 6, kind: input, shape index: {}]   ;;  %s524_s7 = inlined_call_operand.vmem [shape: f32[1,16], index: 7, kind: input, shape index: {}]   ;;  %s525_s8 = inlined_call_operand.vmem [shape: bf16[16,32], index: 8, kind: input, shape index: {}]   ;;  %s526_s9 = inlined_call_operand.vmem [shape: f32[1,32], index: 9, kind: input, shape index: {}]   ;;  %s527_s10 = inlined_call_operand.hbm [shape: f32[16,32], index: 10, kind: output, shape index: {}]  }
   0x1   :  { %16 = vsyncpa [#allocation6], 0 }
   0x2   :  { %17 = vsyncpa [#allocation4], 0  ;;  %s24_s15 = sshll.u32 %s518_s1, 4  ;;  %s401_s16 = smov [#allocation2]   ;;  %s25_s15 = int_to_ptr.hbm [resolvable:$true] %s24_s15 }
   0x3   :  { %s26_s17 = sshll.u32 %s401_s16, 4  ;;  %s37_s20 = sshll.u32 %s519_s2, 4  ;;  %s27_s17 = int_to_ptr.vmem [resolvable:$true] %s26_s17  ;;  %s38_s20 = int_to_ptr.hbm [resolvable:$true] %s37_s20 }
   0x4   :  { %s402_s21 = smov 128   ;;  %s403_s22 = smov 8  }
   0x5   :  { %32 = dma.hbm_to_vmem [thread:$0]  %s25_s15, 256, %s27_s17, [#allocation3], %s402_s21, %s402_s21, %s403_s22  }
   0x6   :  { %s404_s23 = smov [#allocation5]   ;;  %s405_s25 = smov 64  }
   0x7   :  { %s39_s24 = sshll.u32 %s404_s23, 4  ;;  %s406_s1 = smov 4   ;;  %s40_s24 = int_to_ptr.vmem [resolvable:$true] %s39_s24 }
   0x8   :  { %45 = dma.hbm_to_vmem [thread:$0]  %s38_s20, 256, %s40_s24, [#allocation6], %s405_s25, %s405_s25, %s406_s1  }
   0x9   :  { %395 = dma.done.wait [#allocation3], 256  }
   0xa   :  { %396 = vsyncadd [#allocation3], 4294967040 }
   0xb   :  { %397 = dma.done.wait [#allocation6], 256  }
   0xc   :  { %398 = vsyncadd [#allocation6], 4294967040  ;;  %v300_v0 = vld [vmem:[#allocation5 + $0x8] sm:$0xff]  ;;  %v299_v1 = vld [vmem:[#allocation5] sm:$0xff]  ;;  %vm92_vm0 = vcmask 261120   ;;  %v407_v16 = vmov 32.0  }
   0xd   :  { %v69_v2 = vld [vmem:[%s517_s0] sm:$0xff]  ;;  %v70_v3 = vld [vmem:[%s517_s0 + $0x8] sm:$0xff]  ;;  %102 = vmatpush.bf16.msra.mxu0 %v300_v0  ;;  %317 = vrcp.f32 %v407_v16  ;;  %vm232_vm8 = vcmask 130048   ;;  %s262_s24 = sshll.u32 %s527_s10, 4  ;;  %s263_s24 = int_to_ptr.hbm [resolvable:$true] %s262_s24 }
   0xe   :  { %v71_v4 = vpack.c.bf16 %v70_v3, %v69_v2  ;;  %v312_v5 = vld [vmem:[%s520_s3] ss:$0 sm:$0xff]  ;;  %v302_v28 = vld [vmem:[%s523_s6 + $0x8] sm:$0xff] }
   0xf   :  { %209 = vmatpush.bf16.msra.mxu1 %v302_v28  ;;  %v301_v30 = vld [vmem:[%s523_s6] sm:$0xff] }
  0x10   :  { %v313_v55 = vld [vmem:[%s521_s4] ss:$0 sm:$0xff] }
  0x11   :  { %103 = vmatpush.bf16.msra.mxu0 %v299_v1  ;;  %v314_v61 = vld [vmem:[%s522_s5] ss:$0 sm:$0xff] }
  0x12   :  { %v303_v2 = vld [vmem:[%s525_s8] sm:$0xff] }
  0x13   :  { %v318_v17 = vpop.eup %317  ;;  %210 = vmatpush.bf16.msra.mxu1 %v301_v30  ;;  %243 = vmatpush.bf16.msra.mxu2 %v303_v2 }
  0x14   :  { %284 = vmatmul.msk.bf16.vlgmr.msra.gmra.mxu0 %vm92_vm0, %v71_v4  ;;  %v117_v18 = vmul.f32 32.0, %v318_v17  ;;  %vm121_vm1 = vweird.f32 %v318_v17  ;;  %v315_v4 = vld [vmem:[%s524_s7] ss:$0 sm:$0xff]  ;;  %s408_s7 = smov [#allocation7]  }
  0x15   :  { %s260_s8 = sshll.u32 %s408_s7, 4  ;;  %s261_s8 = int_to_ptr.vmem [resolvable:$true] %s260_s8 }
  0x16   :  { %v118_v19 = vsub.f32 1.0, %v117_v18 }
  0x18   :  { %v119_v20 = vmul.f32 %v318_v17, %v118_v19 }
  0x1a   :  { %v120_v21 = vadd.f32 %v318_v17, %v119_v20 }
  0x1c   :  { %v122_v22 = vsel %vm121_vm1, %v318_v17, %v120_v21  ;;  %v251_v17 = vld [vmem:[#allocation2 + $0x8] sm:$0xff] }
  0x91   :  { %v105_v6 = vpop.f32.mrf.mxu0 }
  0x92   :  { %v106_v7 = vadd.f32 %v312_v5, %v105_v6 }
  0x94   :  { %v110_v8 = vsel %vm92_vm0, %v106_v7, 0.0  ;;  %v125_v9 = vmul.f32 %v106_v7, %v106_v7 }
  0x95   :  { %111 = vadd.xlane.f32.xlu0 %v110_v8 }
  0x96   :  { %v127_v10 = vsel %vm92_vm0, %v125_v9, 0.0 }
  0x97   :  { %128 = vadd.xlane.f32.xlu1 %v127_v10 }
  0x99   :  { %v107_v11 = vpop.f32.mrf.mxu0 }
  0x9a   :  { %v108_v12 = vadd.f32 %v312_v5, %v107_v11  ;;  %v316_v11 = vld [vmem:[%s526_s9] ss:$0 sm:$0xff] }
  0x9c   :  { %v113_v13 = vsel %vm92_vm0, %v108_v12, 0.0  ;;  %v126_v14 = vmul.f32 %v108_v12, %v108_v12 }
  0x9d   :  { %114 = vadd.xlane.f32.xlu0 %v113_v13  ;;  %v250_v13 = vld [vmem:[#allocation2] sm:$0xff] }
  0x9e   :  { %v130_v15 = vsel %vm92_vm0, %v126_v14, 0.0 }
  0x9f   :  { %131 = vadd.xlane.f32.xlu1 %v130_v15 }
 0x108   :  { %v112_v23 = vpop.xlane.xlu0 %111 }
 0x109   :  { %v123_v24 = vmul.f32 %v122_v22, %v112_v23 }
 0x10a   :  { %v129_v25 = vpop.xlane.xlu1 %128 }
 0x10b   :  { %v135_v26 = vmul.f32 %v123_v24, %v123_v24  ;;  %v133_v27 = vmul.f32 %v129_v25, %v122_v22  ;;  %v141_v52 = vsub.f32 %v106_v7, %v123_v24 }
 0x10d   :  { %v137_v29 = vsub.f32 %v133_v27, %v135_v26 }
 0x10f   :  { %v139_v31 = vmax.f32 %v137_v29, 0.0 }
 0x110   :  { %v115_v32 = vpop.xlane.xlu0 %114 }
 0x111   :  { %v143_v33 = vadd.f32 1e-12, %v139_v31  ;;  %v124_v34 = vmul.f32 %v122_v22, %v115_v32 }
 0x112   :  { %v132_v35 = vpop.xlane.xlu1 %131 }
 0x113   :  { %319 = vrsqrt.f32 %v143_v33  ;;  %v136_v36 = vmul.f32 %v124_v34, %v124_v34  ;;  %v134_v37 = vmul.f32 %v132_v35, %v122_v22  ;;  %vm151_vm3 = vweird.f32 %v143_v33 }
 0x114   :  { %v142_v57 = vsub.f32 %v108_v12, %v124_v34 }
 0x115   :  { %v138_v38 = vsub.f32 %v134_v37, %v136_v36 }
 0x117   :  { %v140_v39 = vmax.f32 %v138_v38, 0.0 }
 0x119   :  { %v320_v40 = vpop.eup %319  ;;  %v144_v42 = vadd.f32 1e-12, %v140_v39 }
 0x11a   :  { %v146_v41 = vmul.f32 %v320_v40, %v143_v33  ;;  %vm152_vm2 = vweird.f32 %v320_v40 }
 0x11b   :  { %321 = vrsqrt.f32 %v144_v42  ;;  %vm153_vm4 = vmor %vm151_vm3, %vm152_vm2  ;;  %vm161_vm6 = vweird.f32 %v144_v42 }
 0x11c   :  { %v147_v43 = vmul.f32 %v320_v40, %v146_v41 }
 0x11e   :  { %v148_v44 = vmul.f32 0.5, %v147_v43 }
 0x120   :  { %v149_v45 = vsub.f32 1.5, %v148_v44 }
 0x121   :  { %v322_v46 = vpop.eup %321 }
 0x122   :  { %v150_v47 = vmul.f32 %v320_v40, %v149_v45  ;;  %v156_v48 = vmul.f32 %v322_v46, %v144_v42  ;;  %vm162_vm5 = vweird.f32 %v322_v46 }
 0x123   :  { %vm163_vm7 = vmor %vm161_vm6, %vm162_vm5 }
 0x124   :  { %v157_v49 = vmul.f32 %v322_v46, %v156_v48  ;;  %v154_v51 = vsel %vm153_vm4, %v320_v40, %v150_v47 }
 0x125   :  { %v165_v54 = vmul.f32 %v154_v51, %v141_v52 }
 0x126   :  { %v158_v50 = vmul.f32 0.5, %v157_v49 }
 0x127   :  { %v171_v60 = vmul.f32 %v313_v55, %v165_v54 }
 0x128   :  { %v159_v53 = vsub.f32 1.5, %v158_v50 }
 0x129   :  { %v177_v63 = vadd.f32 %v314_v61, %v171_v60 }
 0x12a   :  { %v160_v56 = vmul.f32 %v322_v46, %v159_v53 }
 0x12c   :  { %v164_v58 = vsel %vm163_vm7, %v322_v46, %v160_v56 }
 0x12d   :  { %v166_v59 = vmul.f32 %v164_v58, %v142_v57 }
 0x12f   :  { %v172_v62 = vmul.f32 %v313_v55, %v166_v59 }
 0x131   :  { %v178_v0 = vadd.f32 %v314_v61, %v172_v62 }
 0x133   :  { %v179_v1 = vpack.c.bf16 %v178_v0, %v177_v63 }
 0x135   :  { %293 = vmatmul.msk.bf16.vlgmr.msra.gmra.mxu1 %vm92_vm0, %v179_v1 }
 0x1b2   :  { %v212_v3 = vpop.f32.mrf.mxu1 }
 0x1b3   :  { %v213_v5 = vadd.f32 %v315_v4, %v212_v3 }
 0x1b5   :  { %v217_v8 = vmax.f32 %v213_v5, 0.0 }
 0x1ba   :  { %v214_v6 = vpop.f32.mrf.mxu1 }
 0x1bb   :  { %v215_v7 = vadd.f32 %v315_v4, %v214_v6 }
 0x1bd   :  { %v218_v9 = vmax.f32 %v215_v7, 0.0 }
 0x1bf   :  { %v219_v10 = vpack.c.bf16 %v218_v9, %v217_v8 }
 0x1c1   :  { %298 = vmatmul.msk.bf16.vlgmr.msra.gmra.mxu2 %vm232_vm8, %v219_v10 }
 0x244   :  { %v245_v12 = vpop.f32.mrf.mxu2 }
 0x245   :  { %v246_v14 = vadd.f32 %v316_v11, %v245_v12 }
 0x247   :  { %v252_v15 = vadd.f32 %v250_v13, %v246_v14 }
 0x249   :  { %254 = vst.msk [vmem:[#allocation7] sm:$0xff] %vm92_vm0, %v252_v15 }
 0x24c   :  { %v247_v16 = vpop.f32.mrf.mxu2 }
 0x24d   :  { %v248_v18 = vadd.f32 %v316_v11, %v247_v16 }
 0x24f   :  { %v253_v19 = vadd.f32 %v251_v17, %v248_v18 }
 0x251   :  { %255 = vst.msk [vmem:[#allocation7 + $0x8] sm:$0xff] %vm92_vm0, %v253_v19 }
 0x252   :  { %268 = dma.vmem_to_hbm [thread:$0]  %s261_s8, 256, %s263_s24, [#allocation4], %s402_s21, %s402_s21, %s403_s22  }
 0x253   :  { %399 = dma.done.wait [#allocation4], 256  }
 0x254   :  { %400 = vsyncadd [#allocation4], 4294967040 }
 0x255   :  { %273 = vsyncpa [#allocation3], 1 }
 0x256   :  { %274 = vsyncpa [#allocation6], 1 }
 0x257   :  { %275 = vsyncpa [#allocation4], 1 }

// kernel: tpu_custom_call.1
= control target key start
LH: loop header
LB: loop body
LE: loop exit
PB: predicated region body
PF: predicated region fallthrough
CT: control target
= control target key end

     0   :  { %15 = vsyncpa [#allocation3], 0  ;;  %s517_s0 = inlined_call_operand.vmem [shape: f32[16,32], index: 0, kind: input, shape index: {}]   ;;  %s518_s1 = inlined_call_operand.hbm [shape: f32[16,32], index: 1, kind: input, shape index: {}]   ;;  %s519_s2 = inlined_call_operand.hbm [shape: bf16[32,32], index: 2, kind: input, shape index: {}]   ;;  %s520_s3 = inlined_call_operand.vmem [shape: f32[1,32], index: 3, kind: input, shape index: {}]   ;;  %s521_s4 = inlined_call_operand.vmem [shape: f32[1,32], index: 4, kind: input, shape index: {}]   ;;  %s522_s5 = inlined_call_operand.vmem [shape: f32[1,32], index: 5, kind: input, shape index: {}]   ;;  %s523_s6 = inlined_call_operand.vmem [shape: bf16[32,16], index: 6, kind: input, shape index: {}]   ;;  %s524_s7 = inlined_call_operand.vmem [shape: f32[1,16], index: 7, kind: input, shape index: {}]   ;;  %s525_s8 = inlined_call_operand.vmem [shape: bf16[16,32], index: 8, kind: input, shape index: {}]   ;;  %s526_s9 = inlined_call_operand.vmem [shape: f32[1,32], index: 9, kind: input, shape index: {}]   ;;  %s527_s10 = inlined_call_operand.hbm [shape: f32[16,32], index: 10, kind: output, shape index: {}]  }
   0x1   :  { %16 = vsyncpa [#allocation6], 0 }
   0x2   :  { %17 = vsyncpa [#allocation4], 0  ;;  %s24_s15 = sshll.u32 %s518_s1, 4  ;;  %s401_s16 = smov [#allocation2]   ;;  %s25_s15 = int_to_ptr.hbm [resolvable:$true] %s24_s15 }
   0x3   :  { %s26_s17 = sshll.u32 %s401_s16, 4  ;;  %s37_s20 = sshll.u32 %s519_s2, 4  ;;  %s27_s17 = int_to_ptr.vmem [resolvable:$true] %s26_s17  ;;  %s38_s20 = int_to_ptr.hbm [resolvable:$true] %s37_s20 }
   0x4   :  { %s402_s21 = smov 128   ;;  %s403_s22 = smov 8  }
   0x5   :  { %32 = dma.hbm_to_vmem [thread:$0]  %s25_s15, 256, %s27_s17, [#allocation3], %s402_s21, %s402_s21, %s403_s22  }
   0x6   :  { %s404_s23 = smov [#allocation5]   ;;  %s405_s25 = smov 64  }
   0x7   :  { %s39_s24 = sshll.u32 %s404_s23, 4  ;;  %s406_s1 = smov 4   ;;  %s40_s24 = int_to_ptr.vmem [resolvable:$true] %s39_s24 }
   0x8   :  { %45 = dma.hbm_to_vmem [thread:$0]  %s38_s20, 256, %s40_s24, [#allocation6], %s405_s25, %s405_s25, %s406_s1  }
   0x9   :  { %395 = dma.done.wait [#allocation3], 256  }
   0xa   :  { %396 = vsyncadd [#allocation3], 4294967040 }
   0xb   :  { %397 = dma.done.wait [#allocation6], 256  }
   0xc   :  { %398 = vsyncadd [#allocation6], 4294967040  ;;  %v300_v0 = vld [vmem:[#allocation5 + $0x8] sm:$0xff]  ;;  %v299_v1 = vld [vmem:[#allocation5] sm:$0xff]  ;;  %vm92_vm0 = vcmask 261120   ;;  %v407_v16 = vmov 32.0  }
   0xd   :  { %v69_v2 = vld [vmem:[%s517_s0] sm:$0xff]  ;;  %v70_v3 = vld [vmem:[%s517_s0 + $0x8] sm:$0xff]  ;;  %102 = vmatpush.bf16.msra.mxu0 %v300_v0  ;;  %317 = vrcp.f32 %v407_v16  ;;  %vm232_vm8 = vcmask 130048   ;;  %s262_s24 = sshll.u32 %s527_s10, 4  ;;  %s263_s24 = int_to_ptr.hbm [resolvable:$true] %s262_s24 }
   0xe   :  { %v71_v4 = vpack.c.bf16 %v70_v3, %v69_v2  ;;  %v312_v5 = vld [vmem:[%s520_s3] ss:$0 sm:$0xff]  ;;  %v302_v28 = vld [vmem:[%s523_s6 + $0x8] sm:$0xff] }
   0xf   :  { %209 = vmatpush.bf16.msra.mxu1 %v302_v28  ;;  %v301_v30 = vld [vmem:[%s523_s6] sm:$0xff] }
  0x10   :  { %v313_v55 = vld [vmem:[%s521_s4] ss:$0 sm:$0xff] }
  0x11   :  { %103 = vmatpush.bf16.msra.mxu0 %v299_v1  ;;  %v314_v61 = vld [vmem:[%s522_s5] ss:$0 sm:$0xff] }
  0x12   :  { %v303_v2 = vld [vmem:[%s525_s8] sm:$0xff] }
  0x13   :  { %v318_v17 = vpop.eup %317  ;;  %210 = vmatpush.bf16.msra.mxu1 %v301_v30  ;;  %243 = vmatpush.bf16.msra.mxu2 %v303_v2 }
  0x14   :  { %284 = vmatmul.msk.bf16.vlgmr.msra.gmra.mxu0 %vm92_vm0, %v71_v4  ;;  %v117_v18 = vmul.f32 32.0, %v318_v17  ;;  %vm121_vm1 = vweird.f32 %v318_v17  ;;  %v315_v4 = vld [vmem:[%s524_s7] ss:$0 sm:$0xff]  ;;  %s408_s7 = smov [#allocation7]  }
  0x15   :  { %s260_s8 = sshll.u32 %s408_s7, 4  ;;  %s261_s8 = int_to_ptr.vmem [resolvable:$true] %s260_s8 }
  0x16   :  { %v118_v19 = vsub.f32 1.0, %v117_v18 }
  0x18   :  { %v119_v20 = vmul.f32 %v318_v17, %v118_v19 }
  0x1a   :  { %v120_v21 = vadd.f32 %v318_v17, %v119_v20 }
  0x1c   :  { %v122_v22 = vsel %vm121_vm1, %v318_v17, %v120_v21  ;;  %v251_v17 = vld [vmem:[#allocation2 + $0x8] sm:$0xff] }
  0x91   :  { %v105_v6 = vpop.f32.mrf.mxu0 }
  0x92   :  { %v106_v7 = vadd.f32 %v312_v5, %v105_v6 }
  0x94   :  { %v110_v8 = vsel %vm92_vm0, %v106_v7, 0.0  ;;  %v125_v9 = vmul.f32 %v106_v7, %v106_v7 }
  0x95   :  { %111 = vadd.xlane.f32.xlu0 %v110_v8 }
  0x96   :  { %v127_v10 = vsel %vm92_vm0, %v125_v9, 0.0 }
  0x97   :  { %128 = vadd.xlane.f32.xlu1 %v127_v10 }
  0x99   :  { %v107_v11 = vpop.f32.mrf.mxu0 }
  0x9a   :  { %v108_v12 = vadd.f32 %v312_v5, %v107_v11  ;;  %v316_v11 = vld [vmem:[%s526_s9] ss:$0 sm:$0xff] }
  0x9c   :  { %v113_v13 = vsel %vm92_vm0, %v108_v12, 0.0  ;;  %v126_v14 = vmul.f32 %v108_v12, %v108_v12 }
  0x9d   :  { %114 = vadd.xlane.f32.xlu0 %v113_v13  ;;  %v250_v13 = vld [vmem:[#allocation2] sm:$0xff] }
  0x9e   :  { %v130_v15 = vsel %vm92_vm0, %v126_v14, 0.0 }
  0x9f   :  { %131 = vadd.xlane.f32.xlu1 %v130_v15 }
 0x108   :  { %v112_v23 = vpop.xlane.xlu0 %111 }
 0x109   :  { %v123_v24 = vmul.f32 %v122_v22, %v112_v23 }
 0x10a   :  { %v129_v25 = vpop.xlane.xlu1 %128 }
 0x10b   :  { %v135_v26 = vmul.f32 %v123_v24, %v123_v24  ;;  %v133_v27 = vmul.f32 %v129_v25, %v122_v22  ;;  %v141_v52 = vsub.f32 %v106_v7, %v123_v24 }
 0x10d   :  { %v137_v29 = vsub.f32 %v133_v27, %v135_v26 }
 0x10f   :  { %v139_v31 = vmax.f32 %v137_v29, 0.0 }
 0x110   :  { %v115_v32 = vpop.xlane.xlu0 %114 }
 0x111   :  { %v143_v33 = vadd.f32 1e-12, %v139_v31  ;;  %v124_v34 = vmul.f32 %v122_v22, %v115_v32 }
 0x112   :  { %v132_v35 = vpop.xlane.xlu1 %131 }
 0x113   :  { %319 = vrsqrt.f32 %v143_v33  ;;  %v136_v36 = vmul.f32 %v124_v34, %v124_v34  ;;  %v134_v37 = vmul.f32 %v132_v35, %v122_v22  ;;  %vm151_vm3 = vweird.f32 %v143_v33 }
 0x114   :  { %v142_v57 = vsub.f32 %v108_v12, %v124_v34 }
 0x115   :  { %v138_v38 = vsub.f32 %v134_v37, %v136_v36 }
 0x117   :  { %v140_v39 = vmax.f32 %v138_v38, 0.0 }
 0x119   :  { %v320_v40 = vpop.eup %319  ;;  %v144_v42 = vadd.f32 1e-12, %v140_v39 }
 0x11a   :  { %v146_v41 = vmul.f32 %v320_v40, %v143_v33  ;;  %vm152_vm2 = vweird.f32 %v320_v40 }
 0x11b   :  { %321 = vrsqrt.f32 %v144_v42  ;;  %vm153_vm4 = vmor %vm151_vm3, %vm152_vm2  ;;  %vm161_vm6 = vweird.f32 %v144_v42 }
 0x11c   :  { %v147_v43 = vmul.f32 %v320_v40, %v146_v41 }
 0x11e   :  { %v148_v44 = vmul.f32 0.5, %v147_v43 }
 0x120   :  { %v149_v45 = vsub.f32 1.5, %v148_v44 }
 0x121   :  { %v322_v46 = vpop.eup %321 }
 0x122   :  { %v150_v47 = vmul.f32 %v320_v40, %v149_v45  ;;  %v156_v48 = vmul.f32 %v322_v46, %v144_v42  ;;  %vm162_vm5 = vweird.f32 %v322_v46 }
 0x123   :  { %vm163_vm7 = vmor %vm161_vm6, %vm162_vm5 }
 0x124   :  { %v157_v49 = vmul.f32 %v322_v46, %v156_v48  ;;  %v154_v51 = vsel %vm153_vm4, %v320_v40, %v150_v47 }
 0x125   :  { %v165_v54 = vmul.f32 %v154_v51, %v141_v52 }
 0x126   :  { %v158_v50 = vmul.f32 0.5, %v157_v49 }
 0x127   :  { %v171_v60 = vmul.f32 %v313_v55, %v165_v54 }
 0x128   :  { %v159_v53 = vsub.f32 1.5, %v158_v50 }
 0x129   :  { %v177_v63 = vadd.f32 %v314_v61, %v171_v60 }
 0x12a   :  { %v160_v56 = vmul.f32 %v322_v46, %v159_v53 }
 0x12c   :  { %v164_v58 = vsel %vm163_vm7, %v322_v46, %v160_v56 }
 0x12d   :  { %v166_v59 = vmul.f32 %v164_v58, %v142_v57 }
 0x12f   :  { %v172_v62 = vmul.f32 %v313_v55, %v166_v59 }
 0x131   :  { %v178_v0 = vadd.f32 %v314_v61, %v172_v62 }
 0x133   :  { %v179_v1 = vpack.c.bf16 %v178_v0, %v177_v63 }
 0x135   :  { %293 = vmatmul.msk.bf16.vlgmr.msra.gmra.mxu1 %vm92_vm0, %v179_v1 }
 0x1b2   :  { %v212_v3 = vpop.f32.mrf.mxu1 }
 0x1b3   :  { %v213_v5 = vadd.f32 %v315_v4, %v212_v3 }
 0x1b5   :  { %v217_v8 = vmax.f32 %v213_v5, 0.0 }
 0x1ba   :  { %v214_v6 = vpop.f32.mrf.mxu1 }
 0x1bb   :  { %v215_v7 = vadd.f32 %v315_v4, %v214_v6 }
 0x1bd   :  { %v218_v9 = vmax.f32 %v215_v7, 0.0 }
 0x1bf   :  { %v219_v10 = vpack.c.bf16 %v218_v9, %v217_v8 }
 0x1c1   :  { %298 = vmatmul.msk.bf16.vlgmr.msra.gmra.mxu2 %vm232_vm8, %v219_v10 }
 0x244   :  { %v245_v12 = vpop.f32.mrf.mxu2 }
 0x245   :  { %v246_v14 = vadd.f32 %v316_v11, %v245_v12 }
 0x247   :  { %v252_v15 = vadd.f32 %v250_v13, %v246_v14 }
 0x249   :  { %254 = vst.msk [vmem:[#allocation7] sm:$0xff] %vm92_vm0, %v252_v15 }
 0x24c   :  { %v247_v16 = vpop.f32.mrf.mxu2 }
 0x24d   :  { %v248_v18 = vadd.f32 %v316_v11, %v247_v16 }
 0x24f   :  { %v253_v19 = vadd.f32 %v251_v17, %v248_v18 }
 0x251   :  { %255 = vst.msk [vmem:[#allocation7 + $0x8] sm:$0xff] %vm92_vm0, %v253_v19 }
 0x252   :  { %268 = dma.vmem_to_hbm [thread:$0]  %s261_s8, 256, %s263_s24, [#allocation4], %s402_s21, %s402_s21, %s403_s22  }
 0x253   :  { %399 = dma.done.wait [#allocation4], 256  }
 0x254   :  { %400 = vsyncadd [#allocation4], 4294967040 }
 0x255   :  { %273 = vsyncpa [#allocation3], 1 }
 0x256   :  { %274 = vsyncpa [#allocation6], 1 }
 0x257   :  { %275 = vsyncpa [#allocation4], 1 }

</bundles_post_ra>
